<compile_context>
chip_gen: v7x
topology: tpu7x:2x2x1
jax: 0.10.0
libtpu: 0.0.40
codegen_flags: <defaults>
</compile_context>

<pallas_src>
import functools

import jax
import jax.numpy as jnp
from jax.experimental import pallas as pl
from jax.experimental.pallas import tpu as pltpu

_SUBLANE = 8
_MIN_LANE = 128
_WIDE_LANE = 512      # >=512-wide lanes reach ~85% of HBM roofline
_MAX_ROW_TILE = 256   # (256, 512) f32 block = 512 KiB per operand


# --------------------------------------------------------------------------
# Kernel: tiled sum of |a - b|, finalized to the mean on the last grid step.
# --------------------------------------------------------------------------
def _l1_mean_kernel(a_ref, b_ref, out_ref, acc_ref, *, inv_count):
    @pl.when(pl.program_id(0) == 0)
    def _():
        acc_ref[...] = jnp.zeros_like(acc_ref)

    d = a_ref[...].astype(jnp.float32) - b_ref[...].astype(jnp.float32)
    acc_ref[...] += jnp.sum(jnp.abs(d), axis=(0, 1), keepdims=True)

    @pl.when(pl.program_id(0) == pl.num_programs(0) - 1)
    def _():
        out_ref[...] = acc_ref[...] * inv_count


def l1_loss_mean(pred, target):
    """mean(|pred - target|) for arbitrary (equal) shapes, via Pallas."""
    assert pred.shape == target.shape, (pred.shape, target.shape)
    n = pred.size                                    # true element count
    a = pred.reshape(-1)
    b = target.reshape(-1)

    # Pick a lane-dense 2-D layout and a bounded row tile.
    lane = _WIDE_LANE if n >= _SUBLANE * _WIDE_LANE else _MIN_LANE
    rows = -(-n // lane)                             # cdiv
    row_tile = min(_MAX_ROW_TILE, -(-rows // _SUBLANE) * _SUBLANE)
    rows_pad = -(-rows // row_tile) * row_tile
    pad = rows_pad * lane - n
    if pad:
        # Both operands padded with zeros -> |0 - 0| = 0 adds nothing.
        a = jnp.pad(a, (0, pad))
        b = jnp.pad(b, (0, pad))
    a2 = a.reshape(rows_pad, lane)                   # keep original dtype
    b2 = b.reshape(rows_pad, lane)

    grid = (rows_pad // row_tile,)
    kernel = functools.partial(_l1_mean_kernel, inv_count=1.0 / n)

    out = pl.pallas_call(
        kernel,
        out_shape=jax.ShapeDtypeStruct((1, 1), jnp.float32),
        grid=grid,
        in_specs=[
            pl.BlockSpec((row_tile, lane), lambda i: (i, 0)),
            pl.BlockSpec((row_tile, lane), lambda i: (i, 0)),
        ],
        out_specs=pl.BlockSpec((1, 1), lambda i: (0, 0)),
        scratch_shapes=[pltpu.VMEM((1, 1), jnp.float32)],
        compiler_params=pltpu.CompilerParams(
            dimension_semantics=("arbitrary",)),
    )(a2, b2)
    return out[0, 0]


# --------------------------------------------------------------------------
# Module wrapper matching the PyTorch forward() semantics.
# --------------------------------------------------------------------------
class EquivarianceLossPallas:
    """loss = L1Loss()(kp_d[:, :, :2], reverse_kp)  (mean reduction)."""

    def __call__(self, kp_d, reverse_kp):
        return l1_loss_mean(kp_d[:, :, :2], reverse_kp)


if __name__ == "__main__":
    key = jax.random.PRNGKey(0)
    k1, k2, k3, k4 = jax.random.split(key, 4)

    loss_fn = EquivarianceLossPallas()

    # --- small keypoint-like inputs: batch=2, 10 keypoints, kp_d has 4
    #     values per keypoint (only the first 2 xy coords enter the loss). ---
    B, K, Dk = 2, 10, 4
    kp_d = jax.random.normal(k1, (B, K, Dk), jnp.float32)
    reverse_kp = jax.random.normal(k2, (B, K, 2), jnp.float32)

    loss = jax.block_until_ready(loss_fn(kp_d, reverse_kp))
    ref = jnp.mean(jnp.abs(kp_d[:, :, :2] - reverse_kp))
    assert jnp.allclose(loss, ref, atol=1e-6, rtol=1e-6), (loss, ref)

    # --- larger bf16 case: exercises the 512-lane layout, multi-block
    #     accumulation (grid > 1), padding tail, and the no-f32-precast path.
    B2, K2 = 48, 1500
    kp_d_big = jax.random.normal(k3, (B2, K2, 4), jnp.float32).astype(jnp.bfloat16)
    rev_big = jax.random.normal(k4, (B2, K2, 2), jnp.float32).astype(jnp.bfloat16)

    loss_big = jax.block_until_ready(loss_fn(kp_d_big, rev_big))
    ref_big = jnp.mean(jnp.abs(kp_d_big[:, :, :2].astype(jnp.float32)
                               - rev_big.astype(jnp.float32)))
    assert jnp.allclose(loss_big, ref_big, atol=1e-4, rtol=1e-4), (loss_big, ref_big)

    print("KERNEL_OK")
</pallas_src>

<mosaic_0001>
module attributes {stable_mosaic.version = 11 : i64} {
  func.func @_l1_mean_kernel(%arg0: i32, %arg1: memref<8x128xf32, #tpu.memory_space<vmem>>, %arg2: memref<8x128xf32, #tpu.memory_space<vmem>>, %arg3: memref<1x1xf32, #tpu.memory_space<vmem>>, %arg4: memref<1x1xf32, #tpu.memory_space<vmem>>) attributes {dimension_semantics = [#tpu.dimension_semantics<arbitrary>], iteration_bounds = array<i64: 1>, scalar_prefetch = 0 : i64, scratch_operands = 1 : i64, tpu.core_type = #tpu.core_type<tc>, window_params = [{transform_indices = @transform_0, window_bounds = array<i64: 8, 128>}, {transform_indices = @transform_1, window_bounds = array<i64: 8, 128>}, {pipeline_mode = #tpu.pipeline_mode<synchronous>, transform_indices = @transform_2, window_bounds = array<i64: 1, 1>}]} {
    %c0_i32 = arith.constant 0 : i32
    %0 = arith.cmpi eq, %arg0, %c0_i32 : i32
    %1 = arith.extui %0 : i1 to i32
    %c0_i32_0 = arith.constant 0 : i32
    %2 = arith.cmpi ne, %1, %c0_i32_0 : i32
    scf.if %2 {
      %cst_10 = arith.constant 0.000000e+00 : f32
      %18 = vector.broadcast %cst_10 : f32 to vector<1x1xf32>
      %c0_11 = arith.constant 0 : index
      %c0_12 = arith.constant 0 : index
      %19 = vector.load %arg4[%c0_11, %c0_12] : memref<1x1xf32, #tpu.memory_space<vmem>>, vector<1x1xf32>
      tpu.vector_store %arg4[%c0_11, %c0_12], %18 {strides = array<i32>} : memref<1x1xf32, #tpu.memory_space<vmem>>, vector<1x1xf32>,
    } else {
    }
    %c0 = arith.constant 0 : index
    %c0_1 = arith.constant 0 : index
    %3 = vector.load %arg1[%c0, %c0_1] : memref<8x128xf32, #tpu.memory_space<vmem>>, vector<8x128xf32>
    %c0_2 = arith.constant 0 : index
    %c0_3 = arith.constant 0 : index
    %4 = vector.load %arg2[%c0_2, %c0_3] : memref<8x128xf32, #tpu.memory_space<vmem>>, vector<8x128xf32>
    %5 = arith.subf %3, %4 : vector<8x128xf32>
    %c0_4 = arith.constant 0 : index
    %c0_5 = arith.constant 0 : index
    %6 = vector.load %arg4[%c0_4, %c0_5] : memref<1x1xf32, #tpu.memory_space<vmem>>, vector<1x1xf32>
    %7 = math.absf %5 : vector<8x128xf32>
    %8 = vector.shape_cast %7 : vector<8x128xf32> to vector<1x8x128xf32>
    %cst = arith.constant dense<0.000000e+00> : vector<1xf32>
    %9 = vector.multi_reduction <add>, %8, %cst [1, 2] : vector<1x8x128xf32> to vector<1xf32>
    %10 = vector.shape_cast %9 : vector<1xf32> to vector<1x1x1xf32>
    %11 = vector.extract %10[0, 0, 0] : f32 from vector<1x1x1xf32>
    %12 = vector.broadcast %11 : f32 to vector<1x1xf32>
    %13 = arith.addf %6, %12 : vector<1x1xf32>
    %c0_6 = arith.constant 0 : index
    %c0_7 = arith.constant 0 : index
    %14 = vector.load %arg4[%c0_6, %c0_7] : memref<1x1xf32, #tpu.memory_space<vmem>>, vector<1x1xf32>
    tpu.vector_store %arg4[%c0_6, %c0_7], %13 {strides = array<i32>} : memref<1x1xf32, #tpu.memory_space<vmem>>, vector<1x1xf32>,
    %c0_i32_8 = arith.constant 0 : i32
    %15 = arith.cmpi eq, %arg0, %c0_i32_8 : i32
    %16 = arith.extui %15 : i1 to i32
    %c0_i32_9 = arith.constant 0 : i32
    %17 = arith.cmpi ne, %16, %c0_i32_9 : i32
    scf.if %17 {
      %c0_10 = arith.constant 0 : index
      %c0_11 = arith.constant 0 : index
      %18 = vector.load %arg4[%c0_10, %c0_11] : memref<1x1xf32, #tpu.memory_space<vmem>>, vector<1x1xf32>
      %cst_12 = arith.constant 2.500000e-02 : f32
      %19 = vector.broadcast %cst_12 : f32 to vector<1x1xf32>
      %20 = arith.mulf %18, %19 : vector<1x1xf32>
      %c0_13 = arith.constant 0 : index
      %c0_14 = arith.constant 0 : index
      %21 = vector.load %arg3[%c0_13, %c0_14] : memref<1x1xf32, #tpu.memory_space<vmem>>, vector<1x1xf32>
      tpu.vector_store %arg3[%c0_13, %c0_14], %20 {strides = array<i32>} : memref<1x1xf32, #tpu.memory_space<vmem>>, vector<1x1xf32>,
    } else {
    }
    return
  }
  func.func @transform_0(%arg0: i32) -> (i32, i32) {
    %c0_i32 = arith.constant 0 : i32
    %c0_i32_0 = arith.constant 0 : i32
    return %arg0, %c0_i32 : i32, i32
  }
  func.func @transform_1(%arg0: i32) -> (i32, i32) {
    %c0_i32 = arith.constant 0 : i32
    %c0_i32_0 = arith.constant 0 : i32
    return %arg0, %c0_i32 : i32, i32
  }
  func.func @transform_2(%arg0: i32) -> (i32, i32) {
    %c0_i32 = arith.constant 0 : i32
    %c0_i32_0 = arith.constant 0 : i32
    %c0_i32_1 = arith.constant 0 : i32
    return %c0_i32, %c0_i32_0 : i32, i32
  }
}

</mosaic_0001>

<bundles_post_ra>
// kernel: tpu_custom_call.1
= control target key start
LH: loop header
LB: loop body
LE: loop exit
PB: predicated region body
PF: predicated region fallthrough
CT: control target
= control target key end

     0   :  { %7 = vsyncpa [#allocation4], 0  ;;  %s218_s0 = inlined_call_operand.hbm [shape: f32[8,128], index: 0, kind: input, shape index: {}]   ;;  %s219_s1 = inlined_call_operand.hbm [shape: f32[8,128], index: 1, kind: input, shape index: {}]   ;;  %s220_s2 = inlined_call_operand.hbm [shape: f32[1,1], index: 2, kind: output, shape index: {}]  }
   0x1   :  { %8 = vsyncpa [#allocation7], 0 }
   0x2   :  { %9 = vsyncpa [#allocation5], 0  ;;  %s160_s9 = smov [#allocation3]   ;;  %s161_s11 = smov [#allocation6]  }
   0x3   :  { %s16_s10 = sshll.u32 %s160_s9, 4  ;;  %s26_s12 = sshll.u32 %s161_s11, 4  ;;  %s17_s10 = int_to_ptr.vmem [resolvable:$true] %s16_s10  ;;  %s27_s12 = int_to_ptr.vmem [resolvable:$true] %s26_s12 }
   0x4   :  { %s88_s15 = scalar_lea.hbm %s218_s0, 128 }
   0x5   :  { %p89_p0 = scmp.ne.s32.totalorder %s218_s0, %s88_s15  ;;  %p92_p1 = scmp.lt.u32.totalorder %s88_s15, %s218_s0 }
   0x7   :  { %p94_p2 = pnand %p92_p1, %p89_p0 }
   0x9   :  { %97 = shalt.err (!%p94_p2)
}
   0xa   :  { %s98_s20 = scalar_lea.vmem %s17_s10, 128  ;;  %p103_p4 = scmp.lt.s32.totalorder %s17_s10, %s17_s10 }
   0xb   :  { %p99_p3 = scmp.ne.s32.totalorder %s17_s10, %s98_s20  ;;  %p104_p5 = scmp.lt.s32.totalorder %s98_s20, %s98_s20 }
   0xd   :  { %p105_p6 = por %p104_p5, %p103_p4 }
   0xf   :  { %p106_p7 = pnand %p105_p6, %p99_p3 }
  0x11   :  { %109 = shalt.err (!%p106_p7)
}
  0x12   :  { %19 = dma.hbm_to_vmem [thread:$0]  %s218_s0, 128, %s17_s10, [#allocation4]  }
  0x13   :  { %s110_s25 = scalar_lea.hbm %s219_s1, 128 }
  0x14   :  { %p111_p8 = scmp.ne.s32.totalorder %s219_s1, %s110_s25  ;;  %p114_p9 = scmp.lt.u32.totalorder %s110_s25, %s219_s1 }
  0x16   :  { %p116_p10 = pnand %p114_p9, %p111_p8 }
  0x18   :  { %119 = shalt.err (!%p116_p10)
}
  0x19   :  { %s120_s30 = scalar_lea.vmem %s27_s12, 128  ;;  %p125_p12 = scmp.lt.s32.totalorder %s27_s12, %s27_s12 }
  0x1a   :  { %p121_p11 = scmp.ne.s32.totalorder %s27_s12, %s120_s30  ;;  %p126_p13 = scmp.lt.s32.totalorder %s120_s30, %s120_s30 }
  0x1c   :  { %p127_p0 = por %p126_p13, %p125_p12 }
  0x1e   :  { %p128_p1 = pnand %p127_p0, %p121_p11 }
  0x20   :  { %131 = shalt.err (!%p128_p1)
}
  0x21   :  { %29 = dma.hbm_to_vmem [thread:$0]  %s219_s1, 128, %s27_s12, [#allocation7]  }
  0x22   :  { %154 = dma.done.wait [#allocation4], 128  }
  0x23   :  { %155 = vsyncadd [#allocation4], 4294967168 }
  0x24   :  { %156 = dma.done.wait [#allocation7], 128  }
  0x25   :  { %157 = vsyncadd [#allocation7], 4294967168  ;;  %v42_v0 = vld [vmem:[#allocation3] sm:$0xff]  ;;  %v43_v1 = vld [vmem:[#allocation6] sm:$0xff]  ;;  %vm40_vm0 = vcmask 0   ;;  %v162_v4 = vmov 0.0  }
  0x26   :  { %v44_v2 = vsub.f32 %v42_v0, %v43_v1  ;;  %41 = vst.msk [vmem:[#allocation2] sm:$0x1] %vm40_vm0, %v162_v4  ;;  %s163_s4 = smov [#allocation8]  }
  0x27   :  { %s72_s5 = sshll.u32 %s163_s4, 4  ;;  %s73_s5 = int_to_ptr.vmem [resolvable:$true] %s72_s5 }
  0x28   :  { %v46_v3 = vand.u32 2147483647, %v44_v2  ;;  %s132_s6 = scalar_lea.vmem %s73_s5, 16  ;;  %s136_s7 = scalar_lea.vmem %s73_s5, 32 }
  0x29   :  { %p133_p2 = scmp.ne.s32.totalorder %s73_s5, %s132_s6  ;;  %p137_p3 = scmp.lt.s32.totalorder %s73_s5, %s73_s5 }
  0x2a   :  { %47 = vadd.xlane.f32.xlu0 %v46_v3  ;;  %p138_p4 = scmp.lt.s32.totalorder %s136_s7, %s132_s6 }
  0x2c   :  { %p139_p5 = por %p138_p4, %p137_p3 }
  0x2d   :  { %v45_v12 = vld [vmem:[#allocation2] sm:$0x1] }
  0x2e   :  { %p140_p6 = pnand %p139_p5, %p133_p2 }
  0xb7   :  { %v48_v5 = vpop.xlane.xlu0 %47 }
  0xb8   :  { %v49_v6 = vrot.slane %v48_v5, 4 }
  0xba   :  { %v50_v7 = vadd.f32 %v49_v6, %v48_v5 }
  0xbc   :  { %v51_v8 = vrot.slane %v50_v7, 2 }
  0xbe   :  { %v52_v9 = vadd.f32 %v51_v8, %v50_v7 }
  0xc0   :  { %v53_v10 = vrot.slane %v52_v9, 1 }
  0xc2   :  { %v54_v11 = vadd.f32 %v53_v10, %v52_v9 }
  0xc4   :  { %82 = vpush %v54_v11 }
  0xf5   :  { %s83_s1 = spop %82 }
  0xf6   :  { %v56_v13 = vstv %s83_s1 }
  0xf7   :  { %v57_v14 = vadd.f32 %v56_v13, %v45_v12 }
  0xf9   :  { %59 = vst.msk [vmem:[#allocation2] sm:$0x1] %vm40_vm0, %v57_v14 }
 0x100   :  { %v63_v15 = vld [vmem:[#allocation2] sm:$0x1] }
 0x101   :  { %v64_v16 = vmul.f32 0.025, %v63_v15 }
 0x103   :  { %65 = vst.msk [vmem:[#allocation8] sm:$0x1] %vm40_vm0, %v64_v16 }
 0x104   :  { %143 = shalt.err (!%p140_p6)
}
 0x105   :  { %s144_s10 = scalar_lea.hbm %s220_s2, 16 }
 0x106   :  { %p145_p7 = scmp.ne.s32.totalorder %s220_s2, %s144_s10  ;;  %p148_p8 = scmp.lt.u32.totalorder %s144_s10, %s220_s2 }
 0x108   :  { %p150_p9 = pnand %p148_p8, %p145_p7 }
 0x10a   :  { %153 = shalt.err (!%p150_p9)
}
 0x10b   :  { %75 = dma.vmem_to_hbm [thread:$0]  %s73_s5, 16, %s220_s2, [#allocation5]  }
 0x10c   :  { %158 = dma.done.wait [#allocation5], 16  }
 0x10d   :  { %159 = vsyncadd [#allocation5], 4294967280 }
 0x10e   :  { %79 = vsyncpa [#allocation4], 1 }
 0x10f   :  { %80 = vsyncpa [#allocation7], 1 }
 0x110   :  { %81 = vsyncpa [#allocation5], 1 }

</bundles_post_ra>
